<compile_context>
chip_gen: v6e
topology: v6e:2x2x1
jax: 0.10.0
libtpu: 0.0.40
codegen_flags: <defaults>
</compile_context>

<pallas_src>
import jax
import jax.numpy as jnp
from jax.experimental import pallas as pl
from jax.experimental.pallas import tpu as pltpu


_LANE = 128
_NEG = -1e30  # "minus infinity" bias for padded action columns (exp -> 0)


def _round_up(x, m):
    return ((x + m - 1) // m) * m


def _policy_kernel(x_ref, w1_ref, w2_ref, w3_ref, b_ref, out_ref):
    # x: (TB, D) f32, w*: bf16, b: (3, Hmax) f32, out: (2, TB, NPAD) f32
    h1_dim = w1_ref.shape[1]
    h2_dim = w2_ref.shape[1]
    npad = w3_ref.shape[1]

    x = x_ref[...].astype(jnp.bfloat16)

    h1 = jnp.dot(x, w1_ref[...], preferred_element_type=jnp.float32)
    h1 = jnp.maximum(h1 + b_ref[0:1, :h1_dim], 0.0)            # Linear + ReLU

    h2 = jnp.dot(h1.astype(jnp.bfloat16), w2_ref[...],
                 preferred_element_type=jnp.float32)
    h2 = jnp.maximum(h2 + b_ref[1:2, :h2_dim], 0.0)            # Linear + ReLU

    logits = jnp.dot(h2.astype(jnp.bfloat16), w3_ref[...],
                     preferred_element_type=jnp.float32)
    logits = logits + b_ref[2:3, :npad]                        # final Linear

    # Numerically stable log_softmax over the (lane-padded) action axis.
    # Padded columns have logits ~ -1e30 so exp(z) is exactly 0 there.
    m = jnp.max(logits, axis=1, keepdims=True)
    z = logits - m
    e = jnp.exp(z)
    s = jnp.sum(e, axis=1, keepdims=True)
    logp = z - jnp.log(s)
    p = e * pl.reciprocal(s, approx=True)                      # reuse exp(z)

    out_ref[0, :, :] = logp
    out_ref[1, :, :] = p


def init_params(key, input_dim, num_actions, hidden_units=(256, 256)):
    """Xavier-uniform weights, zero biases (matches initialize_weights_xavier).

    Weights are stored (in_features, out_features), i.e. the transpose of the
    PyTorch nn.Linear layout.
    """
    dims = (input_dim,) + tuple(hidden_units) + (num_actions,)
    params = {}
    keys = jax.random.split(key, len(dims) - 1)
    for i, (fan_in, fan_out) in enumerate(zip(dims[:-1], dims[1:]), start=1):
        limit = jnp.sqrt(6.0 / (fan_in + fan_out))
        params[f"w{i}"] = jax.random.uniform(
            keys[i - 1], (fan_in, fan_out), jnp.float32, -limit, limit)
        params[f"b{i}"] = jnp.zeros((fan_out,), jnp.float32)
    return params


def prepare_kernel_params(params, num_actions):
    """One-time conversion of f32 params into packed kernel operands.

    Do this ONCE per set of weights (outside the env-step loop) so per-call
    cost is only the (halved, bf16) weight DMA.
    TODO(synk): for per-step inference, weights could additionally be pinned
    VMEM-resident across calls via a cross-pallas_call prefetch (P10 pattern).
    """
    w1, w2, w3 = params["w1"], params["w2"], params["w3"]
    b1 = params["b1"].reshape(-1)
    b2 = params["b2"].reshape(-1)
    b3 = params["b3"].reshape(-1)

    d, h1 = w1.shape
    h2 = w2.shape[1]
    a = w3.shape[1]
    assert a == num_actions
    npad = _round_up(max(a, _LANE), _LANE)          # lane-dense action dim
    hmax = max(h1, h2, npad)

    w3p = jnp.zeros((h2, npad), jnp.float32).at[:, :a].set(w3)

    bias = jnp.zeros((3, hmax), jnp.float32)
    bias = bias.at[0, :h1].set(b1)
    bias = bias.at[1, :h2].set(b2)
    bias = bias.at[2, :].set(_NEG)                  # padded actions -> -inf
    bias = bias.at[2, :a].set(b3)

    return {
        "w1": w1.astype(jnp.bfloat16),
        "w2": w2.astype(jnp.bfloat16),
        "w3": w3p.astype(jnp.bfloat16),
        "bias": bias,
        "num_actions": a,
    }


def _run_policy_net(feature_actions, kparams):
    """Runs the MLP + log_softmax kernel; returns (log_probs, probs)."""
    B, D = feature_actions.shape
    w1, w2, w3, bias = (kparams["w1"], kparams["w2"], kparams["w3"],
                        kparams["bias"])
    h1 = w1.shape[1]
    h2 = w2.shape[1]
    npad = w3.shape[1]
    hmax = bias.shape[1]

    # Batch tiling: one tile for small B; 256-row tiles for large B (keeps the
    # grid axis "parallel" for v7x's two TensorCores and fits v7x 64 MiB VMEM).
    if B <= 256:
        tb = _round_up(max(B, 8), 8)
    else:
        tb = 256
    b_pad = _round_up(B, tb)
    if b_pad != B:
        feature_actions = jnp.pad(feature_actions, ((0, b_pad - B), (0, 0)))

    out = pl.pallas_call(
        _policy_kernel,
        out_shape=jax.ShapeDtypeStruct((2, b_pad, npad), jnp.float32),
        grid_spec=pltpu.PrefetchScalarGridSpec(
            num_scalar_prefetch=0,
            grid=(b_pad // tb,),
            in_specs=[
                pl.BlockSpec((tb, D), lambda i: (i, 0)),       # activations
                pl.BlockSpec((D, h1), lambda i: (0, 0)),       # w1 (replicated)
                pl.BlockSpec((h1, h2), lambda i: (0, 0)),      # w2 (replicated)
                pl.BlockSpec((h2, npad), lambda i: (0, 0)),    # w3 (replicated)
                pl.BlockSpec((3, hmax), lambda i: (0, 0)),     # packed biases
            ],
            out_specs=pl.BlockSpec((2, tb, npad), lambda i: (0, i, 0)),
        ),
        compiler_params=pltpu.CompilerParams(
            dimension_semantics=("parallel",)),
    )(feature_actions, w1, w2, w3, bias)

    a = kparams["num_actions"]
    log_action_probs = out[0, :B, :a]
    action_probs = out[1, :B, :a]
    return log_action_probs, action_probs


def categorical_policy_forward(feature_actions, kparams, key=None,
                               deterministic=False):
    assert feature_actions.ndim == 2
    log_action_probs, action_probs = _run_policy_net(feature_actions, kparams)

    if deterministic:
        # torch.argmax(net(x), dim=1, keepdim=True)  (argmax of log_softmax
        # equals argmax of the raw logits).
        return jnp.argmax(log_action_probs, axis=1, keepdims=True)

    # Categorical(action_probs).sample().view(-1, 1)
    # TODO(synk): RNG stream differs from torch.distributions; distribution matches.
    actions = jax.random.categorical(key, log_action_probs, axis=1).reshape(-1, 1)
    return actions, action_probs, log_action_probs


if __name__ == "__main__":
    key = jax.random.PRNGKey(0)
    k_param, k_input, k_sample = jax.random.split(key, 3)

    batch = 8
    input_dim = 32
    num_actions = 16

    params = init_params(k_param, input_dim, num_actions, hidden_units=(256, 256))
    kparams = prepare_kernel_params(params, num_actions)   # once, reused every step
    feature_actions = jax.random.normal(k_input, (batch, input_dim), jnp.float32)

    # Stochastic branch.
    actions, action_probs, log_action_probs = categorical_policy_forward(
        feature_actions, kparams, k_sample, deterministic=False)
    jax.block_until_ready((actions, action_probs, log_action_probs))

    # Deterministic branch.
    greedy_actions = categorical_policy_forward(
        feature_actions, kparams, deterministic=True)
    jax.block_until_ready(greedy_actions)

    # Pure-JAX reference using the same bf16-weight / f32-accumulation recipe.
    def ref_log_probs(x):
        xb = x.astype(jnp.bfloat16)
        h = jnp.maximum(
            jnp.dot(xb, params["w1"].astype(jnp.bfloat16),
                    preferred_element_type=jnp.float32) + params["b1"], 0.0)
        h = jnp.maximum(
            jnp.dot(h.astype(jnp.bfloat16), params["w2"].astype(jnp.bfloat16),
                    preferred_element_type=jnp.float32) + params["b2"], 0.0)
        logits = jnp.dot(h.astype(jnp.bfloat16),
                         params["w3"].astype(jnp.bfloat16),
                         preferred_element_type=jnp.float32) + params["b3"]
        return jax.nn.log_softmax(logits, axis=1)

    ref_logp = ref_log_probs(feature_actions)

    assert actions.shape == (batch, 1)
    assert greedy_actions.shape == (batch, 1)
    assert action_probs.shape == (batch, num_actions)
    assert log_action_probs.shape == (batch, num_actions)
    assert jnp.allclose(jnp.sum(action_probs, axis=1), 1.0, atol=1e-2)
    assert jnp.allclose(log_action_probs, ref_logp, atol=2e-2, rtol=2e-2)
    assert jnp.allclose(action_probs, jnp.exp(ref_logp), atol=2e-2)
    assert jnp.array_equal(greedy_actions[:, 0], jnp.argmax(ref_logp, axis=1))

    print("KERNEL_OK")
</pallas_src>

<mosaic_0001>
module attributes {stable_mosaic.version = 11 : i64} {
  func.func @_policy_kernel(%arg0: i32, %arg1: memref<8x32xf32, #tpu.memory_space<vmem>>, %arg2: memref<32x256xbf16, #tpu.memory_space<vmem>>, %arg3: memref<256x256xbf16, #tpu.memory_space<vmem>>, %arg4: memref<256x128xbf16, #tpu.memory_space<vmem>>, %arg5: memref<3x256xf32, #tpu.memory_space<vmem>>, %arg6: memref<2x8x128xf32, #tpu.memory_space<vmem>>) attributes {dimension_semantics = [#tpu.dimension_semantics<parallel>], iteration_bounds = array<i64: 1>, scalar_prefetch = 0 : i64, scratch_operands = 0 : i64, tpu.core_type = #tpu.core_type<tc>, window_params = [{transform_indices = @transform_0, window_bounds = array<i64: 8, 32>}, {pipeline_mode = #tpu.pipeline_mode<synchronous>, transform_indices = @transform_1, window_bounds = array<i64: 32, 256>}, {pipeline_mode = #tpu.pipeline_mode<synchronous>, transform_indices = @transform_2, window_bounds = array<i64: 256, 256>}, {pipeline_mode = #tpu.pipeline_mode<synchronous>, transform_indices = @transform_3, window_bounds = array<i64: 256, 128>}, {pipeline_mode = #tpu.pipeline_mode<synchronous>, transform_indices = @transform_4, window_bounds = array<i64: 3, 256>}, {transform_indices = @transform_5, window_bounds = array<i64: 2, 8, 128>}]} {
    %c0 = arith.constant 0 : index
    %c0_0 = arith.constant 0 : index
    %0 = vector.load %arg1[%c0, %c0_0] : memref<8x32xf32, #tpu.memory_space<vmem>>, vector<8x32xf32>
    %1 = arith.truncf %0 : vector<8x32xf32> to vector<8x32xbf16>
    %c0_1 = arith.constant 0 : index
    %c0_2 = arith.constant 0 : index
    %2 = vector.load %arg2[%c0_1, %c0_2] : memref<32x256xbf16, #tpu.memory_space<vmem>>, vector<32x256xbf16>
    %cst = arith.constant dense<0.000000e+00> : vector<8x256xf32>
    %3 = tpu.matmul %1, %2, %cst {dimension_numbers = #tpu.dot_dimension_numbers<[1], [0], [0], [1], [0, 0, 1, 1], [], []>} : vector<8x32xbf16>, vector<32x256xbf16>, vector<8x256xf32> -> vector<8x256xf32>
    %c0_3 = arith.constant 0 : index
    %c0_4 = arith.constant 0 : index
    %4 = vector.load %arg5[%c0_3, %c0_4] : memref<3x256xf32, #tpu.memory_space<vmem>>, vector<1x256xf32>
    %5 = vector.broadcast %4 : vector<1x256xf32> to vector<8x256xf32>
    %6 = arith.addf %3, %5 : vector<8x256xf32>
    %cst_5 = arith.constant 0.000000e+00 : f32
    %7 = vector.broadcast %cst_5 : f32 to vector<8x256xf32>
    %8 = arith.maximumf %6, %7 : vector<8x256xf32>
    %9 = arith.truncf %8 : vector<8x256xf32> to vector<8x256xbf16>
    %c0_6 = arith.constant 0 : index
    %c0_7 = arith.constant 0 : index
    %10 = vector.load %arg3[%c0_6, %c0_7] : memref<256x256xbf16, #tpu.memory_space<vmem>>, vector<256x256xbf16>
    %cst_8 = arith.constant dense<0.000000e+00> : vector<8x256xf32>
    %11 = tpu.matmul %9, %10, %cst_8 {dimension_numbers = #tpu.dot_dimension_numbers<[1], [0], [0], [1], [0, 0, 1, 1], [], []>} : vector<8x256xbf16>, vector<256x256xbf16>, vector<8x256xf32> -> vector<8x256xf32>
    %c1 = arith.constant 1 : index
    %c0_9 = arith.constant 0 : index
    %12 = vector.load %arg5[%c1, %c0_9] : memref<3x256xf32, #tpu.memory_space<vmem>>, vector<1x256xf32>
    %13 = vector.broadcast %12 : vector<1x256xf32> to vector<8x256xf32>
    %14 = arith.addf %11, %13 : vector<8x256xf32>
    %cst_10 = arith.constant 0.000000e+00 : f32
    %15 = vector.broadcast %cst_10 : f32 to vector<8x256xf32>
    %16 = arith.maximumf %14, %15 : vector<8x256xf32>
    %17 = arith.truncf %16 : vector<8x256xf32> to vector<8x256xbf16>
    %c0_11 = arith.constant 0 : index
    %c0_12 = arith.constant 0 : index
    %18 = vector.load %arg4[%c0_11, %c0_12] : memref<256x128xbf16, #tpu.memory_space<vmem>>, vector<256x128xbf16>
    %cst_13 = arith.constant dense<0.000000e+00> : vector<8x128xf32>
    %19 = tpu.matmul %17, %18, %cst_13 {dimension_numbers = #tpu.dot_dimension_numbers<[1], [0], [0], [1], [0, 0, 1, 1], [], []>} : vector<8x256xbf16>, vector<256x128xbf16>, vector<8x128xf32> -> vector<8x128xf32>
    %c2 = arith.constant 2 : index
    %c0_14 = arith.constant 0 : index
    %20 = vector.load %arg5[%c2, %c0_14] : memref<3x256xf32, #tpu.memory_space<vmem>>, vector<1x128xf32>
    %21 = vector.broadcast %20 : vector<1x128xf32> to vector<8x128xf32>
    %22 = arith.addf %19, %21 : vector<8x128xf32>
    %cst_15 = arith.constant dense<0xFF800000> : vector<8xf32>
    %23 = vector.multi_reduction <maximumf>, %22, %cst_15 [1] : vector<8x128xf32> to vector<8xf32>
    %24 = vector.shape_cast %23 : vector<8xf32> to vector<8x1xf32>
    %25 = vector.broadcast %24 : vector<8x1xf32> to vector<8x128xf32>
    %26 = arith.subf %22, %25 : vector<8x128xf32>
    %27 = math.exp %26 : vector<8x128xf32>
    %cst_16 = arith.constant dense<0.000000e+00> : vector<8xf32>
    %28 = vector.multi_reduction <add>, %27, %cst_16 [1] : vector<8x128xf32> to vector<8xf32>
    %29 = vector.shape_cast %28 : vector<8xf32> to vector<8x1xf32>
    %30 = math.log %29 : vector<8x1xf32>
    %31 = vector.broadcast %30 : vector<8x1xf32> to vector<8x128xf32>
    %32 = arith.subf %26, %31 : vector<8x128xf32>
    %33 = tpu.reciprocal %29 {approx = true} : vector<8x1xf32> -> vector<8x1xf32>
    %34 = vector.broadcast %33 : vector<8x1xf32> to vector<8x128xf32>
    %35 = arith.mulf %27, %34 : vector<8x128xf32>
    %c0_17 = arith.constant 0 : index
    %c0_18 = arith.constant 0 : index
    %c0_19 = arith.constant 0 : index
    %36 = vector.load %arg6[%c0_17, %c0_18, %c0_19] : memref<2x8x128xf32, #tpu.memory_space<vmem>>, vector<1x8x128xf32>
    %37 = vector.shape_cast %36 : vector<1x8x128xf32> to vector<8x128xf32>
    %38 = vector.shape_cast %32 : vector<8x128xf32> to vector<1x8x128xf32>
    tpu.vector_store %arg6[%c0_17, %c0_18, %c0_19], %38 {strides = array<i32>} : memref<2x8x128xf32, #tpu.memory_space<vmem>>, vector<1x8x128xf32>,
    %c1_20 = arith.constant 1 : index
    %c0_21 = arith.constant 0 : index
    %c0_22 = arith.constant 0 : index
    %39 = vector.load %arg6[%c1_20, %c0_21, %c0_22] : memref<2x8x128xf32, #tpu.memory_space<vmem>>, vector<1x8x128xf32>
    %40 = vector.shape_cast %39 : vector<1x8x128xf32> to vector<8x128xf32>
    %41 = vector.shape_cast %35 : vector<8x128xf32> to vector<1x8x128xf32>
    tpu.vector_store %arg6[%c1_20, %c0_21, %c0_22], %41 {strides = array<i32>} : memref<2x8x128xf32, #tpu.memory_space<vmem>>, vector<1x8x128xf32>,
    return
  }
  func.func @transform_0(%arg0: i32) -> (i32, i32) {
    %c0_i32 = arith.constant 0 : i32
    %c0_i32_0 = arith.constant 0 : i32
    return %arg0, %c0_i32 : i32, i32
  }
  func.func @transform_1(%arg0: i32) -> (i32, i32) {
    %c0_i32 = arith.constant 0 : i32
    %c0_i32_0 = arith.constant 0 : i32
    %c0_i32_1 = arith.constant 0 : i32
    return %c0_i32, %c0_i32_0 : i32, i32
  }
  func.func @transform_2(%arg0: i32) -> (i32, i32) {
    %c0_i32 = arith.constant 0 : i32
    %c0_i32_0 = arith.constant 0 : i32
    %c0_i32_1 = arith.constant 0 : i32
    return %c0_i32, %c0_i32_0 : i32, i32
  }
  func.func @transform_3(%arg0: i32) -> (i32, i32) {
    %c0_i32 = arith.constant 0 : i32
    %c0_i32_0 = arith.constant 0 : i32
    %c0_i32_1 = arith.constant 0 : i32
    return %c0_i32, %c0_i32_0 : i32, i32
  }
  func.func @transform_4(%arg0: i32) -> (i32, i32) {
    %c0_i32 = arith.constant 0 : i32
    %c0_i32_0 = arith.constant 0 : i32
    %c0_i32_1 = arith.constant 0 : i32
    return %c0_i32, %c0_i32_0 : i32, i32
  }
  func.func @transform_5(%arg0: i32) -> (i32, i32, i32) {
    %c0_i32 = arith.constant 0 : i32
    %c0_i32_0 = arith.constant 0 : i32
    %c0_i32_1 = arith.constant 0 : i32
    return %c0_i32, %arg0, %c0_i32_0 : i32, i32, i32
  }
}

</mosaic_0001>

<bundles_post_ra>
// kernel: tpu_custom_call.1
= control target key start
LH: loop header
LB: loop body
LE: loop exit
PB: predicated region body
PF: predicated region fallthrough
CT: control target
= control target key end

     0   :  { %10 = vsyncpa [#allocation3], 0  ;;  %s989_s0 = inlined_call_operand.hbm [shape: f32[8,32], index: 0, kind: input, shape index: {}]   ;;  %s990_s1 = inlined_call_operand.hbm [shape: bf16[32,256], index: 1, kind: input, shape index: {}]   ;;  %s991_s2 = inlined_call_operand.hbm [shape: bf16[256,256], index: 2, kind: input, shape index: {}]   ;;  %s992_s3 = inlined_call_operand.hbm [shape: bf16[256,128], index: 3, kind: input, shape index: {}]   ;;  %s993_s4 = inlined_call_operand.hbm [shape: f32[3,256], index: 4, kind: input, shape index: {}]   ;;  %s994_s5 = inlined_call_operand.hbm [shape: f32[2,8,128], index: 5, kind: output, shape index: {}]  }
   0x1   :  { %11 = vsyncpa [#allocation6], 0 }
   0x2   :  { %12 = vsyncpa [#allocation9], 0 }
   0x3   :  { %13 = vsyncpa [#allocation4], 0  ;;  %s921_s18 = smov [#allocation5]  }
   0x4   :  { %s29_s19 = sshll.u32 %s921_s18, 4  ;;  %s30_s19 = int_to_ptr.vmem [resolvable:$true] %s29_s19 }
   0x5   :  { %s801_s20 = scalar_lea.vmem %s30_s19, 512  ;;  %p806_p1 = scmp.lt.s32.totalorder %s30_s19, %s30_s19 }
   0x6   :  { %p802_p0 = scmp.ne.s32.totalorder %s30_s19, %s801_s20  ;;  %p807_p2 = scmp.lt.s32.totalorder %s801_s20, %s801_s20 }
   0x8   :  { %p808_p3 = por %p807_p2, %p806_p1 }
   0xa   :  { %p809_p4 = pnand %p808_p3, %p802_p0 }
   0xc   :  { %812 = shalt.err (!%p809_p4)
}
   0xd   :  { %s922_s21 = smov 128   ;;  %s923_s22 = smov 8  }
   0xe   :  { %35 = dma.hbm_to_vmem [thread:$0]  %s990_s1, 512, %s30_s19, [#allocation6], %s922_s21, %s922_s21, %s923_s22  }
   0xf   :  { %s924_s25 = smov [#allocation8]  }
  0x10   :  { %s53_s26 = sshll.u32 %s924_s25, 4  ;;  %s54_s26 = int_to_ptr.vmem [resolvable:$true] %s53_s26 }
  0x11   :  { %s821_s27 = scalar_lea.vmem %s54_s26, 2048  ;;  %p826_p6 = scmp.lt.s32.totalorder %s54_s26, %s54_s26 }
  0x12   :  { %p822_p5 = scmp.ne.s32.totalorder %s54_s26, %s821_s27  ;;  %p827_p7 = scmp.lt.s32.totalorder %s821_s27, %s821_s27 }
  0x14   :  { %p828_p8 = por %p827_p7, %p826_p6 }
  0x16   :  { %p829_p9 = pnand %p828_p8, %p822_p5 }
  0x18   :  { %832 = shalt.err (!%p829_p9)
}
  0x19   :  { %s925_s28 = smov 64   ;;  %s926_s29 = smov 4  }
  0x1a   :  { %59 = dma.hbm_to_vmem [thread:$0]  %s992_s3, 2048, %s54_s26, [#allocation9], %s925_s28, %s925_s28, %s926_s29  }
  0x1b   :  { %s927_s7 = smov [#allocation2]   ;;  %s928_s9 = smov [#allocation7]  }
  0x1c   :  { %s20_s8 = sshll.u32 %s927_s7, 4  ;;  %s41_s1 = sshll.u32 %s928_s9, 4  ;;  %s21_s8 = int_to_ptr.vmem [resolvable:$true] %s20_s8  ;;  %s42_s1 = int_to_ptr.vmem [resolvable:$true] %s41_s1 }
  0x1d   :  { %s841_s10 = scalar_lea.vmem %s21_s8, 128  ;;  %p846_p11 = scmp.lt.s32.totalorder %s21_s8, %s21_s8 }
  0x1e   :  { %p842_p10 = scmp.ne.s32.totalorder %s21_s8, %s841_s10  ;;  %p847_p12 = scmp.lt.s32.totalorder %s841_s10, %s841_s10 }
  0x20   :  { %p848_p13 = por %p847_p12, %p846_p11 }
  0x22   :  { %p849_p0 = pnand %p848_p13, %p842_p10 }
  0x24   :  { %852 = shalt.err (!%p849_p0)
}
  0x25   :  { %23 = dma.hbm_to_vmem [thread:$0]  %s989_s0, 128, %s21_s8, [#allocation3]  }
  0x26   :  { %s861_s13 = scalar_lea.vmem %s42_s1, 4096  ;;  %p866_p2 = scmp.lt.s32.totalorder %s42_s1, %s42_s1 }
  0x27   :  { %p862_p1 = scmp.ne.s32.totalorder %s42_s1, %s861_s13  ;;  %p867_p3 = scmp.lt.s32.totalorder %s861_s13, %s861_s13 }
  0x29   :  { %p868_p4 = por %p867_p3, %p866_p2 }
  0x2b   :  { %p869_p5 = pnand %p868_p4, %p862_p1 }
  0x2d   :  { %872 = shalt.err (!%p869_p5)
}
  0x2e   :  { %47 = dma.hbm_to_vmem [thread:$0]  %s991_s2, 4096, %s42_s1, [#allocation6], %s922_s21, %s922_s21, %s923_s22  }
  0x2f   :  { %s929_s15 = smov [#allocation10]  }
  0x30   :  { %s66_s16 = sshll.u32 %s929_s15, 4  ;;  %s67_s16 = int_to_ptr.vmem [resolvable:$true] %s66_s16 }
  0x31   :  { %s881_s17 = scalar_lea.vmem %s67_s16, 128  ;;  %p886_p7 = scmp.lt.s32.totalorder %s67_s16, %s67_s16 }
  0x32   :  { %p882_p6 = scmp.ne.s32.totalorder %s67_s16, %s881_s17  ;;  %p887_p8 = scmp.lt.s32.totalorder %s881_s17, %s881_s17 }
  0x34   :  { %p888_p9 = por %p887_p8, %p886_p7 }
  0x36   :  { %p889_p10 = pnand %p888_p9, %p882_p6 }
  0x38   :  { %892 = shalt.err (!%p889_p10)
}
  0x39   :  { %69 = dma.hbm_to_vmem [thread:$0]  %s993_s4, 128, %s67_s16, [#allocation9]  }
  0x3a   :  { %913 = dma.done.wait [#allocation3], 128  }
  0x3b   :  { %914 = vsyncadd [#allocation3], 4294967168 }
  0x3c   :  { %915 = dma.done.wait [#allocation6], 4608  }
  0x3d   :  { %916 = vsyncadd [#allocation6], 4294962688 }
  0x3e   :  { %917 = dma.done.wait [#allocation9], 2176  }
  0x3f   :  { %918 = vsyncadd [#allocation9], 4294965120  ;;  %v930_v0 = vmov 0   ;;  %v717_v1 = vld [vmem:[#allocation5 + $0x14] ss:$8 sps:$4 sm:$0xff]   ;;  %vm124_vm0 = vcmask 261120   ;;  %v94_v51 = vlaneseq }
  0x40   :  { %160 = vmatprep.mubr.bf16.mxu0 %v930_v0  ;;  %v719_v2 = vld [vmem:[#allocation5 + $0x10] ss:$8 sps:$4 sm:$0xff]   ;;  %140 = vmatprep.subr.bf16.mxu0 %v717_v1  ;;  %v720_v3 = vld [vmem:[#allocation5 + $0x4] ss:$8 sps:$4 sm:$0xff]   ;;  %v722_v4 = vld [vmem:[#allocation5] ss:$8 sps:$4 sm:$0xff]  }
  0x41   :  { %v86_v5 = vld [vmem:[#allocation2] sm:$0xff]  ;;  %141 = vmatpush1.bf16.msra.mxu0 %v719_v2  ;;  %v726_v8 = vld [vmem:[#allocation7 + $0x64] ss:$8 sps:$4 sm:$0xff]   ;;  %v728_v10 = vld [vmem:[#allocation7 + $0x60] ss:$8 sps:$4 sm:$0xff]   ;;  %v95_v52 = vshrl.u32 %v94_v51, 7 }
  0x42   :  { %v723_v6 = vld [vmem:[#allocation7 + $0x74] ss:$8 sps:$4 sm:$0xff]   ;;  %142 = vmatprep.subr.bf16.mxu0 %v720_v3  ;;  %v725_v7 = vld [vmem:[#allocation7 + $0x70] ss:$8 sps:$4 sm:$0xff]   ;;  %v87_v9 = vpack.c.bf16 %v86_v5, %v86_v5  ;;  %v732_v13 = vld [vmem:[#allocation7 + $0x44] ss:$8 sps:$4 sm:$0xff]  }
  0x43   :  { %378 = vmatprep.subr.bf16.mxu1 %v723_v6  ;;  %v729_v11 = vld [vmem:[#allocation7 + $0x54] ss:$8 sps:$4 sm:$0xff]   ;;  %v731_v12 = vld [vmem:[#allocation7 + $0x50] ss:$8 sps:$4 sm:$0xff]   ;;  %v734_v14 = vld [vmem:[#allocation7 + $0x40] ss:$8 sps:$4 sm:$0xff]  }
  0x44   :  { %379 = vmatpush1.bf16.msra.mxu1 %v725_v7  ;;  %v735_v15 = vld [vmem:[#allocation7 + $0x34] ss:$8 sps:$4 sm:$0xff]   ;;  %v737_v16 = vld [vmem:[#allocation7 + $0x30] ss:$8 sps:$4 sm:$0xff]   ;;  %v738_v17 = vld [vmem:[#allocation7 + $0x24] ss:$8 sps:$4 sm:$0xff]  }
  0x45   :  { %143 = vmatpush1.bf16.msra.mxu0 %v722_v4  ;;  %380 = vmatprep.subr.bf16.mxu1 %v726_v8  ;;  %v740_v18 = vld [vmem:[#allocation7 + $0x20] ss:$8 sps:$4 sm:$0xff]   ;;  %v741_v19 = vld [vmem:[#allocation7 + $0x14] ss:$8 sps:$4 sm:$0xff]   ;;  %v743_v20 = vld [vmem:[#allocation7 + $0x10] ss:$8 sps:$4 sm:$0xff]  }
  0x46   :  { %v744_v21 = vld [vmem:[#allocation7 + $0x4] ss:$8 sps:$4 sm:$0xff]   ;;  %v746_v22 = vld [vmem:[#allocation7] ss:$8 sps:$4 sm:$0xff]   ;;  %v747_v23 = vld [vmem:[#allocation7 + $0xf4] ss:$8 sps:$4 sm:$0xff]  }
  0x47   :  { %v749_v24 = vld [vmem:[#allocation7 + $0xf0] ss:$8 sps:$4 sm:$0xff]   ;;  %v750_v25 = vld [vmem:[#allocation7 + $0xe4] ss:$8 sps:$4 sm:$0xff]   ;;  %v752_v26 = vld [vmem:[#allocation7 + $0xe0] ss:$8 sps:$4 sm:$0xff]  }
  0x48   :  { %634 = vmatmul.mubr.msk.bf16.vlgmr.msra.gmra.mxu0 %vm124_vm0, %v87_v9  ;;  %381 = vmatpush1.bf16.msra.mxu1 %v728_v10  ;;  %v753_v27 = vld [vmem:[#allocation7 + $0xd4] ss:$8 sps:$4 sm:$0xff]   ;;  %v755_v28 = vld [vmem:[#allocation7 + $0xd0] ss:$8 sps:$4 sm:$0xff]   ;;  %v756_v29 = vld [vmem:[#allocation7 + $0xc4] ss:$8 sps:$4 sm:$0xff]  }
  0x49   :  { %382 = vmatprep.subr.bf16.mxu1 %v729_v11  ;;  %v758_v30 = vld [vmem:[#allocation7 + $0xc0] ss:$8 sps:$4 sm:$0xff]   ;;  %v759_v31 = vld [vmem:[#allocation7 + $0xb4] ss:$8 sps:$4 sm:$0xff]   ;;  %v761_v32 = vld [vmem:[#allocation7 + $0xb0] ss:$8 sps:$4 sm:$0xff]  }
  0x4a   :  { %v762_v33 = vld [vmem:[#allocation7 + $0xa4] ss:$8 sps:$4 sm:$0xff]   ;;  %v764_v34 = vld [vmem:[#allocation7 + $0xa0] ss:$8 sps:$4 sm:$0xff]   ;;  %v765_v35 = vld [vmem:[#allocation7 + $0x94] ss:$8 sps:$4 sm:$0xff]  }
  0x4b   :  { %v767_v36 = vld [vmem:[#allocation7 + $0x90] ss:$8 sps:$4 sm:$0xff]   ;;  %v768_v37 = vld [vmem:[#allocation7 + $0x84] ss:$8 sps:$4 sm:$0xff]   ;;  %v770_v38 = vld [vmem:[#allocation7 + $0x80] ss:$8 sps:$4 sm:$0xff]  }
  0x4c   :  { %383 = vmatpush1.bf16.msra.mxu1 %v731_v12  ;;  %v771_v39 = vld [vmem:[#allocation8 + $0x78] sm:$0xff]   ;;  %v773_v41 = vld [vmem:[#allocation8 + $0x70] sm:$0xff]   ;;  %v775_v43 = vld [vmem:[#allocation8 + $0x68] sm:$0xff]   ;;  %v96_v53 = vsub.s32 0, %v95_v52  ;;  %v100_v55 = vsub.s32 1, %v95_v52  ;;  %s931_s2 = smov [#allocation11]  }
  0x4d   :  { %384 = vmatprep.subr.bf16.mxu1 %v732_v13  ;;  %v772_v40 = vld [vmem:[#allocation8 + $0x38] sm:$0xff]   ;;  %684 = vmatprep.subr.bf16.mxu0 %v771_v39  ;;  %v774_v42 = vld [vmem:[#allocation8 + $0x30] sm:$0xff]   ;;  %v776_v44 = vld [vmem:[#allocation8 + $0x28] sm:$0xff]   ;;  %s616_s4 = sshll.u32 %s931_s2, 4  ;;  %s617_s4 = int_to_ptr.vmem [resolvable:$true] %s616_s4 }
  0x4e   :  { %685 = vmatpush3.bf16.msra.mxu0 %v772_v40  ;;  %v777_v45 = vld [vmem:[#allocation8 + $0x60] sm:$0xff]   ;;  %v779_v47 = vld [vmem:[#allocation8 + $0x58] sm:$0xff]   ;;  %v781_v49 = vld [vmem:[#allocation8 + $0x50] sm:$0xff]   ;;  %s893_s19 = scalar_lea.vmem %s617_s4, 256  ;;  %p898_p12 = scmp.lt.s32.totalorder %s617_s4, %s617_s4 }
  0x4f   :  { %686 = vmatprep.subr.bf16.mxu0 %v773_v41  ;;  %v778_v46 = vld [vmem:[#allocation8 + $0x20] sm:$0xff]   ;;  %v780_v48 = vld [vmem:[#allocation8 + $0x18] sm:$0xff]   ;;  %v782_v50 = vld [vmem:[#allocation8 + $0x10] sm:$0xff]   ;;  %p894_p11 = scmp.ne.s32.totalorder %s617_s4, %s893_s19  ;;  %p899_p13 = scmp.lt.s32.totalorder %s893_s19, %s893_s19 }
  0x50   :  { %385 = vmatpush1.bf16.msra.mxu1 %v734_v14  ;;  %v92_v54 = vld [vmem:[#allocation10] ss:$4 sm:$0x3]  ;;  %v783_v4 = vld [vmem:[#allocation8 + $0x48] sm:$0xff]  }
  0x51   :  { %386 = vmatprep.subr.bf16.mxu1 %v735_v15  ;;  %v97_v56 = vrot.slane %v92_v54, %v96_v53  ;;  %v101_v57 = vrot.slane %v92_v54, %v100_v55  ;;  %v784_v5 = vld [vmem:[#allocation8 + $0x8] sm:$0xff]   ;;  %v785_v6 = vld [vmem:[#allocation8 + $0x40] sm:$0xff]   ;;  %p900_p0 = por %p899_p13, %p898_p12 }
  0x52   :  { %687 = vmatpush3.bf16.msra.mxu0 %v774_v42  ;;  %v786_v7 = vld [vmem:[#allocation8] sm:$0xff]  }
  0x53   :  { %688 = vmatprep.subr.bf16.mxu0 %v775_v43  ;;  %v206_v8 = vld [vmem:[#allocation10 + $0x1] ss:$4 sm:$0x3]  ;;  %p901_p1 = pnand %p900_p0, %p894_p11 }
  0x54   :  { %387 = vmatpush1.bf16.msra.mxu1 %v737_v16  ;;  %v211_v9 = vrot.slane %v206_v8, %v96_v53  ;;  %v215_v10 = vrot.slane %v206_v8, %v100_v55 }
  0x55   :  { %388 = vmatprep.subr.bf16.mxu1 %v738_v17 }
  0x56   :  { %689 = vmatpush3.bf16.msra.mxu0 %v776_v44 }
  0x57   :  { %690 = vmatprep.subr.bf16.mxu0 %v777_v45 }
  0x58   :  { %389 = vmatpush1.bf16.msra.mxu1 %v740_v18 }
  0x59   :  { %390 = vmatprep.subr.bf16.mxu1 %v741_v19 }
  0x5a   :  { %691 = vmatpush3.bf16.msra.mxu0 %v778_v46 }
  0x5b   :  { %692 = vmatprep.subr.bf16.mxu0 %v779_v47 }
  0x5c   :  { %391 = vmatpush1.bf16.msra.mxu1 %v743_v20 }
  0x5d   :  { %392 = vmatprep.subr.bf16.mxu1 %v744_v21 }
  0x5e   :  { %693 = vmatpush3.bf16.msra.mxu0 %v780_v48 }
  0x5f   :  { %694 = vmatprep.subr.bf16.mxu0 %v781_v49 }
  0x60   :  { %393 = vmatpush1.bf16.msra.mxu1 %v746_v22 }
  0x61   :  { %394 = vmatprep.subr.bf16.mxu1 %v747_v23  ;;  %v667_v23 = vld [vmem:[#allocation10 + $0x2] ss:$0 sm:$0xff] }
  0x62   :  { %695 = vmatpush3.bf16.msra.mxu0 %v782_v50 }
  0x63   :  { %696 = vmatprep.subr.bf16.mxu0 %v783_v4 }
  0x64   :  { %395 = vmatpush2.bf16.msra.mxu1 %v749_v24 }
  0x65   :  { %396 = vmatprep.subr.bf16.mxu1 %v750_v25 }
  0x66   :  { %697 = vmatpush3.bf16.msra.mxu0 %v784_v5 }
  0x67   :  { %698 = vmatprep.subr.bf16.mxu0 %v785_v6 }
  0x68   :  { %397 = vmatpush2.bf16.msra.mxu1 %v752_v26 }
  0x69   :  { %398 = vmatprep.subr.bf16.mxu1 %v753_v27 }
  0x6a   :  { %699 = vmatpush3.bf16.msra.mxu0 %v786_v7 }
  0x6c   :  { %399 = vmatpush2.bf16.msra.mxu1 %v755_v28 }
  0x6d   :  { %400 = vmatprep.subr.bf16.mxu1 %v756_v29 }
  0x70   :  { %401 = vmatpush2.bf16.msra.mxu1 %v758_v30 }
  0x71   :  { %402 = vmatprep.subr.bf16.mxu1 %v759_v31 }
  0x74   :  { %403 = vmatpush2.bf16.msra.mxu1 %v761_v32 }
  0x75   :  { %404 = vmatprep.subr.bf16.mxu1 %v762_v33 }
  0x78   :  { %405 = vmatpush2.bf16.msra.mxu1 %v764_v34 }
  0x79   :  { %406 = vmatprep.subr.bf16.mxu1 %v765_v35 }
  0x7c   :  { %407 = vmatpush2.bf16.msra.mxu1 %v767_v36 }
  0x7d   :  { %408 = vmatprep.subr.bf16.mxu1 %v768_v37 }
  0x80   :  { %409 = vmatpush2.bf16.msra.mxu1 %v770_v38 }
 0x108   :  { %v162_v58 = vpop.f32.mrf.mxu0 }
 0x109   :  { %v163_v59 = vadd.f32 %v162_v58, %v97_v56 }
 0x10a   :  { %v164_v60 = vpop.f32.mrf.mxu0 }
 0x10b   :  { %v165_v61 = vadd.f32 %v164_v60, %v101_v57  ;;  %v169_v62 = vmax.f32 %v163_v59, 0.0 }
 0x10c   :  { %v166_v63 = vpop.f32.mrf.mxu0 }
 0x10d   :  { %v170_v0 = vmax.f32 %v165_v61, 0.0  ;;  %v171_v3 = vpack.c.bf16 %v169_v62, %v169_v62 }
 0x10e   :  { %v167_v1 = vpop.f32.mrf.mxu0 }
 0x10f   :  { %v172_v2 = vpack.c.bf16 %v170_v0, %v170_v0 }
 0x111   :  { %410 = vmatprep.mubr.bf16.mxu1 %v172_v2 }
 0x112   :  { %411 = vmatmul.mubr.bf16.vlgmr.msra.gmra.mxu1 %v171_v3 }
 0x1d2   :  { %v412_v11 = vpop.f32.mrf.mxu1 }
 0x1d3   :  { %v413_v12 = vadd.f32 %v412_v11, %v211_v9 }
 0x1d4   :  { %v414_v13 = vpop.f32.mrf.mxu1 }
 0x1d5   :  { %v415_v14 = vadd.f32 %v414_v13, %v215_v10  ;;  %v419_v15 = vmax.f32 %v413_v12, 0.0 }
 0x1d6   :  { %v416_v16 = vpop.f32.mrf.mxu1 }
 0x1d7   :  { %v420_v17 = vmax.f32 %v415_v14, 0.0  ;;  %v421_v20 = vpack.c.bf16 %v419_v15, %v419_v15 }
 0x1d8   :  { %v417_v18 = vpop.f32.mrf.mxu1 }
 0x1d9   :  { %v422_v19 = vpack.c.bf16 %v420_v17, %v420_v17 }
 0x1db   :  { %588 = vmatprep.mubr.bf16.mxu0 %v422_v19 }
 0x1dc   :  { %589 = vmatmul.mubr.bf16.vlgmr.msra.gmra.mxu0 %v421_v20 }
 0x29c   :  { %v700_v21 = vpop.f32.mrf.mxu0 }
 0x29e   :  { %v701_v22 = vpop.f32.mrf.mxu0 }
 0x29f   :  { %v702_v24 = vadd.f32 %v701_v22, %v700_v21 }
 0x2a0   :  { %v703_v25 = vpop.f32.mrf.mxu0 }
 0x2a1   :  { %v591_v26 = vadd.f32 %v702_v24, %v667_v23 }
 0x2a2   :  { %v704_v27 = vpop.f32.mrf.mxu0 }
 0x2a3   :  { %596 = vmax.xlane.f32.xlu0 %v591_v26 }
 0x32c   :  { %v597_v28 = vpop.xlane.xlu0 %596 }
 0x32d   :  { %v598_v29 = vsub.f32 %v591_v26, %v597_v28 }
 0x32f   :  { %v599_v30 = vmul.f32 1.442695, %v598_v29 }
 0x331   :  { %787 = vpow2.f32 %v599_v30 }
 0x33e   :  { %v788_v31 = vpop.eup %787 }
 0x33f   :  { %601 = vadd.xlane.f32.xlu0 %v788_v31 }
 0x3c8   :  { %v602_v32 = vpop.xlane.xlu0 %601 }
 0x3c9   :  { %789 = vlog2.f32 %v602_v32 }
 0x3ca   :  { %791 = vrcp.f32 %v602_v32 }
 0x3d6   :  { %v790_v33 = vpop.eup %789 }
 0x3d7   :  { %v792_v34 = vpop.eup %791  ;;  %v604_v35 = vmul.f32 0.6931472, %v790_v33 }
 0x3d8   :  { %v607_v36 = vmul.f32 %v792_v34, %v788_v31 }
 0x3d9   :  { %v605_v37 = vsub.f32 %v598_v29, %v604_v35 }
 0x3da   :  { %610 = vst [vmem:[#allocation11 + $0x8] sm:$0xff] %v607_v36 }
 0x3db   :  { %608 = vst [vmem:[#allocation11] sm:$0xff] %v605_v37 }
 0x3dc   :  { %904 = shalt.err (!%p901_p1)
}
 0x3dd   :  { %622 = dma.vmem_to_hbm [thread:$0]  %s617_s4, 256, %s994_s5, [#allocation4], %s922_s21, %s922_s21, %s923_s22  }
 0x3de   :  { %919 = dma.done.wait [#allocation4], 256  }
 0x3df   :  { %920 = vsyncadd [#allocation4], 4294967040 }
 0x3e0   :  { %626 = vsyncpa [#allocation3], 1 }
 0x3e1   :  { %627 = vsyncpa [#allocation6], 1 }
 0x3e2   :  { %628 = vsyncpa [#allocation9], 1 }
 0x3e3   :  { %629 = vsyncpa [#allocation4], 1 }

</bundles_post_ra>
